<compile_context>
chip_gen: v7x
topology: tpu7x:2x2x1
jax: 0.10.0
libtpu: 0.0.40
codegen_flags: <defaults>
</compile_context>

<pallas_src>
import functools

import jax
import jax.numpy as jnp
from jax.experimental import pallas as pl
from jax.experimental.pallas import tpu as pltpu

LANE = 128
SUBLANE = 8
MIN_TILE = 32  # int8 adjacency packs (32, 128); keep row tiles aligned to it.


def _round_up(x, m):
    return ((x + m - 1) // m) * m


def _vmem_capacity_bytes():
    try:
        return int(pltpu.get_tpu_info().vmem_capacity_bytes)
    except Exception:
        return 64 * 1024 * 1024  # conservative fallback = v7x per-TC VMEM


def _compiler_params(dimension_semantics):
    cap = min(_vmem_capacity_bytes(), 128 * 1024 * 1024)
    return pltpu.CompilerParams(dimension_semantics=dimension_semantics,
                                vmem_limit_bytes=int(cap * 0.7))


# ----------------------------------------------------------------------------
# Capability probes (tiny lowerings, cached; silently fall back if unsupported)
# ----------------------------------------------------------------------------
def _probe_lowers(build_fn):
    try:
        build_fn()
        return True
    except Exception:
        return False


@functools.lru_cache(maxsize=None)
def _buffered_ok():
    """True if this JAX single-buffers a BlockSpec via pipeline_mode=Buffered(1)."""
    def build():
        def copy_kernel(x_ref, o_ref):
            o_ref[...] = x_ref[...]
        fn = pl.pallas_call(
            copy_kernel,
            out_shape=jax.ShapeDtypeStruct((8, 128), jnp.float32),
            grid=(1,),
            in_specs=[pl.BlockSpec((8, 128), lambda i: (0, 0),
                                   pipeline_mode=pl.Buffered(1))],
            out_specs=pl.BlockSpec((8, 128), lambda i: (0, 0)))
        jax.jit(fn).lower(jax.ShapeDtypeStruct((8, 128), jnp.float32)).compile()
    return _probe_lowers(build)


@functools.lru_cache(maxsize=None)
def _bf16_exp_ok():
    """True if bf16 exp lowers cleanly on this device (v6e/v7x EUP path)."""
    def build():
        def exp_kernel(x_ref, o_ref):
            o_ref[...] = jnp.exp(x_ref[...])
        fn = pl.pallas_call(
            exp_kernel,
            out_shape=jax.ShapeDtypeStruct((16, 128), jnp.bfloat16),
            grid=(1,),
            in_specs=[pl.BlockSpec((16, 128), lambda i: (0, 0))],
            out_specs=pl.BlockSpec((16, 128), lambda i: (0, 0)))
        jax.jit(fn).lower(jax.ShapeDtypeStruct((16, 128), jnp.bfloat16)).compile()
    return _probe_lowers(build)


@functools.lru_cache(maxsize=None)
def _elementwise_dtype():
    """bf16 hot path on v6e/v7x (2x VPU/EUP throughput), f32 on v5e and older."""
    try:
        kind = jax.devices()[0].device_kind.lower()
    except Exception:
        kind = ""
    if any(g in kind for g in ("v2", "v3", "v4", "v5")):
        return jnp.float32
    return jnp.bfloat16 if _bf16_exp_ok() else jnp.float32


def _resident_spec(shape):
    """BlockSpec for an operand whose block index never changes."""
    zeros = tuple(0 for _ in shape)
    index_map = lambda *_: zeros
    if _buffered_ok():
        # Default double-buffering is pure waste for never-changing blocks.
        return pl.BlockSpec(shape, index_map, pipeline_mode=pl.Buffered(1))
    return pl.BlockSpec(shape, index_map)


# ----------------------------------------------------------------------------
# Tile / chunk selection against device VMEM
# ----------------------------------------------------------------------------
def _choose_tiles(n, hf_pad, h_pad, heads, elem_bytes):
    """Pick (row tile, source chunk, padded node count)."""
    n8 = _round_up(n, SUBLANE)
    budget = int(min(_vmem_capacity_bytes(), 128 * 1024 * 1024) * 0.55)

    def fits(tile, chunk):
        stream = 2 * (tile * h_pad * 4          # alpha_dst tile
                      + h_pad * chunk * 4       # alpha_src^T chunk
                      + tile * chunk            # adj chunk (int8)
                      + chunk * hf_pad * 2      # xw chunk (bf16)
                      + tile * hf_pad * 4)      # out tile
        resident = 2 * (hf_pad * 4 + h_pad * hf_pad * 4)   # bias + head-select
        scratch = 2 * tile * LANE * 4 + tile * hf_pad * 4  # m, l, acc
        temps = (heads + 2) * tile * chunk * elem_bytes + 2 * tile * chunk * 4
        return stream + resident + scratch + temps <= budget

    if n8 < 2 * MIN_TILE:                 # tiny graph: one row tile, one chunk
        return n8, n8, n8
    if n8 <= 1024:                        # small/medium: single source chunk
        for tile in (512, 256, 128, 64, 32):
            n_pad = _round_up(n8, tile)
            # >=2 row tiles so v7x's second TensorCore gets work.
            if tile <= n8 // 2 and fits(tile, n_pad):
                return tile, n_pad, n_pad
        n_pad = _round_up(n8, MIN_TILE)
        return MIN_TILE, n_pad, n_pad
    for tile in (512, 256, 128):          # large: flash-style source chunking
        for chunk in (1024, 512, 256, 128):
            if fits(tile, chunk):
                n_pad = _round_up(n8, max(tile, chunk))
                return tile, chunk, n_pad
    return 128, 128, _round_up(n8, 128)


# ----------------------------------------------------------------------------
# Kernels
# ----------------------------------------------------------------------------
def _gat_proj_kernel(x_ref, w_ref, a_ref, xw_ref, alpha_ref):
    """xw = x @ W (bf16 MXU, f32 acc); alpha = xw @ [a_src | a_dst] (one dot)."""
    x = x_ref[...].astype(jnp.bfloat16)                                # [T, Fin]
    xw = jnp.dot(x, w_ref[...], preferred_element_type=jnp.float32)   # [T, HFp]
    # Tiny fused logits dot kept in f32 so attention logits carry no extra
    # bf16 rounding.
    alpha_ref[...] = jnp.dot(xw, a_ref[...],
                             preferred_element_type=jnp.float32)       # [T, 2Hp]
    xw_ref[...] = xw.astype(jnp.bfloat16)


def _gat_attn_kernel(adst_ref, asrct_ref, adj_ref, xw_ref, bias_ref, hsel_ref,
                     out_ref, m_ref, l_ref, acc_ref, *,
                     heads, f_out, apply_relu, apply_log_softmax, compute_dtype):
    """Masked multi-head attention, online softmax over source chunks."""
    j = pl.program_id(1)

    @pl.when(j == 0)
    def _init():
        m_ref[...] = jnp.full(m_ref.shape, -jnp.inf, m_ref.dtype)
        l_ref[...] = jnp.zeros(l_ref.shape, l_ref.dtype)
        acc_ref[...] = jnp.zeros(acc_ref.shape, acc_ref.dtype)

    # int8 -> f32 -> compute dtype (chunk-sized, reused by every head).
    mask = adj_ref[...].astype(jnp.float32).astype(compute_dtype)      # [T, C]
    adst = adst_ref[...]                                               # [T, Hp]
    neg_slope = jnp.asarray(0.2, compute_dtype)

    # Static unroll over heads (<=8): with source chunking the per-head
    # temporaries are only [T, C]; fori_loop would need dynamic lane slicing
    # at f_out<128 offsets (relayouts) for no VMEM win.
    for h in range(heads):
        a_d = adst[:, h:h + 1].astype(compute_dtype)                   # [T, 1]
        a_s = asrct_ref[h:h + 1, :].astype(compute_dtype)              # [1, C]
        s = a_d + a_s                                                  # [T, C]
        s = jnp.maximum(s, neg_slope * s)                              # LeakyReLU
        m_prev = m_ref[:, h:h + 1]                                     # [T, 1]
        m_cur = jnp.max(s, axis=1, keepdims=True).astype(jnp.float32)
        m_new = jnp.maximum(m_prev, m_cur)
        # Multiply-mask online softmax: max over unmasked logits never
        # overflows (exp <= 1) and normalization makes it exact; every row has
        # a self-loop so the denominator is positive.
        p = jnp.exp(s - m_new.astype(compute_dtype)) * mask            # [T, C]
        corr = jnp.exp(m_prev - m_new)                                 # [T, 1]
        l_ref[:, h:h + 1] = corr * l_ref[:, h:h + 1] + jnp.sum(
            p, axis=1, keepdims=True, dtype=jnp.float32)
        m_ref[:, h:h + 1] = m_new
        lo, hi = h * f_out, (h + 1) * f_out
        acc_ref[:, lo:hi] = corr * acc_ref[:, lo:hi] + jnp.dot(
            p.astype(jnp.bfloat16), xw_ref[:, lo:hi],
            preferred_element_type=jnp.float32)

    @pl.when(j == pl.num_programs(1) - 1)
    def _finalize():
        # Broadcast per-head 1/denominator across that head's f_out lanes with
        # one tiny MXU dot against the 0/1 head-select matrix, so the final
        # store stays lane-dense (single full-width write per row tile).
        inv = pl.reciprocal(jnp.maximum(l_ref[...], 1e-30), approx=True)
        inv_full = jnp.dot(inv, hsel_ref[...],
                           preferred_element_type=jnp.float32)          # [T,HFp]
        z = acc_ref[...] * inv_full + bias_ref[...]
        if apply_relu:
            z = jnp.maximum(z, 0.0)
        if apply_log_softmax:
            hf = heads * f_out
            lane = jax.lax.broadcasted_iota(jnp.int32, z.shape, 1)
            valid = lane < hf
            mx = jnp.max(jnp.where(valid, z, -jnp.inf), axis=1, keepdims=True)
            ez = jnp.where(valid, jnp.exp(z - mx), 0.0)
            z = jnp.where(valid,
                          z - mx - jnp.log(jnp.sum(ez, axis=1, keepdims=True)),
                          0.0)
        out_ref[...] = z


# ----------------------------------------------------------------------------
# Layer wrapper
# ----------------------------------------------------------------------------
def gat_conv(x, w_pad, a_fused, bias_pad, hsel, adj_i8, *, heads, f_out, hf_pad,
             h_pad, tile, chunk, n_pad, apply_relu, apply_log_softmax,
             compute_dtype):
    assert not (apply_log_softmax and heads != 1)
    f_in = x.shape[1]
    rows, chunks = n_pad // tile, n_pad // chunk

    xw, alpha = pl.pallas_call(
        _gat_proj_kernel,
        out_shape=(jax.ShapeDtypeStruct((n_pad, hf_pad), jnp.bfloat16),
                   jax.ShapeDtypeStruct((n_pad, 2 * h_pad), jnp.float32)),
        grid=(rows,),
        in_specs=[pl.BlockSpec((tile, f_in), lambda i: (i, 0)),  # x (streamed)
                  _resident_spec((f_in, hf_pad)),                # W (bf16)
                  _resident_spec((hf_pad, 2 * h_pad))],          # [a_src|a_dst]
        out_specs=(pl.BlockSpec((tile, hf_pad), lambda i: (i, 0)),
                   pl.BlockSpec((tile, 2 * h_pad), lambda i: (i, 0))),
        compiler_params=_compiler_params(("parallel",)),
    )(x, w_pad, a_fused)

    asrct = alpha[:, :h_pad].T          # [Hp, N]  layout plumbing outside kernel
    adst = alpha[:, h_pad:]             # [N, Hp]

    out = pl.pallas_call(
        functools.partial(_gat_attn_kernel, heads=heads, f_out=f_out,
                          apply_relu=apply_relu,
                          apply_log_softmax=apply_log_softmax,
                          compute_dtype=compute_dtype),
        out_shape=jax.ShapeDtypeStruct((n_pad, hf_pad), jnp.float32),
        grid=(rows, chunks),
        in_specs=[pl.BlockSpec((tile, h_pad), lambda i, j: (i, 0)),   # alpha_dst
                  pl.BlockSpec((h_pad, chunk), lambda i, j: (0, j)),  # alpha_src^T
                  pl.BlockSpec((tile, chunk), lambda i, j: (i, j)),   # adj (int8)
                  pl.BlockSpec((chunk, hf_pad), lambda i, j: (j, 0)), # xw (bf16)
                  _resident_spec((1, hf_pad)),                        # bias
                  _resident_spec((h_pad, hf_pad))],                   # head-select
        out_specs=pl.BlockSpec((tile, hf_pad), lambda i, j: (i, 0)),
        scratch_shapes=[pltpu.VMEM((tile, h_pad), jnp.float32),   # running max
                        pltpu.VMEM((tile, h_pad), jnp.float32),   # running denom
                        pltpu.VMEM((tile, hf_pad), jnp.float32)], # accumulator
        compiler_params=_compiler_params(("parallel", "arbitrary")),
    )(adst, asrct, adj_i8, xw, bias_pad, hsel)
    return out


# ----------------------------------------------------------------------------
# Parameters (shapes follow torch_geometric GATConv) and packing
# ----------------------------------------------------------------------------
def _glorot(key, shape):
    fan_in, fan_out = shape[0], shape[-1]
    lim = jnp.sqrt(6.0 / (fan_in + fan_out))
    return jax.random.uniform(key, shape, jnp.float32, -lim, lim)


def init_gat_params(key, in_channels, hidden_channels, out_channels, heads):
    ks = jax.random.split(key, 6)
    p = {}
    # conv1: GATConv(in, hidden, heads=heads, concat=True)
    p["w1"] = _glorot(ks[0], (in_channels, heads * hidden_channels))
    p["att_src1"] = _glorot(ks[1], (heads, hidden_channels))
    p["att_dst1"] = _glorot(ks[2], (heads, hidden_channels))
    p["b1"] = jnp.zeros((heads * hidden_channels,), jnp.float32)
    # conv2: GATConv(hidden*heads, out, heads=1, concat=False)
    p["w2"] = _glorot(ks[3], (heads * hidden_channels, out_channels))
    p["att_src2"] = _glorot(ks[4], (1, out_channels))
    p["att_dst2"] = _glorot(ks[5], (1, out_channels))
    p["b2"] = jnp.zeros((out_channels,), jnp.float32)
    return p


def _pack_layer(w, att_src, att_dst, bias, *, in_pad):
    """Pad W/bias to lane-dense widths, fuse att_src/att_dst into one
    block-diagonal [HF_pad, 2*H_pad] matrix, build the 0/1 head-select matrix
    used to broadcast per-head softmax denominators across lanes."""
    f_in, hf = w.shape
    heads, f_out = att_src.shape
    hf_pad = _round_up(hf, LANE)
    h_pad = _round_up(heads, SUBLANE)

    w_pad = jnp.zeros((in_pad, hf_pad), jnp.float32).at[:f_in, :hf].set(w)
    a = jnp.zeros((hf_pad, 2 * h_pad), jnp.float32)
    hsel = jnp.zeros((h_pad, hf_pad), jnp.float32)
    for h in range(heads):
        a = a.at[h * f_out:(h + 1) * f_out, h].set(att_src[h])
        a = a.at[h * f_out:(h + 1) * f_out, h_pad + h].set(att_dst[h])
        hsel = hsel.at[h, h * f_out:(h + 1) * f_out].set(1.0)
    b = jnp.zeros((1, hf_pad), jnp.float32).at[0, :hf].set(bias)
    cfg = dict(heads=heads, f_out=f_out, hf_pad=hf_pad, h_pad=h_pad)
    return w_pad.astype(jnp.bfloat16), a, b, hsel, cfg


def gat_forward(params, x, adj_i8, *, heads, hidden, out_channels,
                max_chunk=None):
    """2-layer GAT: conv1 -> ReLU -> (dropout: eval identity) -> conv2 ->
    log_softmax (fused into conv2's attention kernel)."""
    n = x.shape[0]
    hf1_pad = _round_up(heads * hidden, LANE)
    hf2_pad = _round_up(out_channels, LANE)
    h_pad = _round_up(heads, SUBLANE)
    compute_dtype = _elementwise_dtype()
    elem_bytes = 2 if compute_dtype == jnp.bfloat16 else 4
    tile, chunk, n_pad = _choose_tiles(n, max(hf1_pad, hf2_pad), h_pad, heads,
                                       elem_bytes)
    if max_chunk is not None and max_chunk < chunk:
        c = max(LANE, _round_up(max_chunk, LANE))
        if n_pad % c == 0:
            chunk = c

    # Pad nodes; add self-loops on the FULL padded diagonal (matches GATConv
    # add_self_loops=True; keeps padded rows finite so no NaN ever leaks).
    x_pad = jnp.zeros((n_pad, x.shape[1]), jnp.float32).at[:n, :].set(x)
    adj_pad = jnp.zeros((n_pad, n_pad), jnp.int8).at[:n, :n].set(adj_i8)
    adj_pad = adj_pad.at[jnp.arange(n_pad), jnp.arange(n_pad)].set(1)

    w1, a1, b1, s1, c1 = _pack_layer(params["w1"], params["att_src1"],
                                     params["att_dst1"], params["b1"],
                                     in_pad=x.shape[1])
    h1 = gat_conv(x_pad, w1, a1, b1, s1, adj_pad, tile=tile, chunk=chunk,
                  n_pad=n_pad, apply_relu=True, apply_log_softmax=False,
                  compute_dtype=compute_dtype, **c1)

    # TODO(synk): F.dropout / GATConv attention dropout are identity in eval mode.

    w2, a2, b2, s2, c2 = _pack_layer(params["w2"], params["att_src2"],
                                     params["att_dst2"], params["b2"],
                                     in_pad=c1["hf_pad"])
    h2 = gat_conv(h1, w2, a2, b2, s2, adj_pad, tile=tile, chunk=chunk,
                  n_pad=n_pad, apply_relu=False, apply_log_softmax=True,
                  compute_dtype=compute_dtype, **c2)
    return h2[:n, :out_channels]


# ----------------------------------------------------------------------------
# Pure-JAX reference (f32) with PyG GATConv eval semantics
# ----------------------------------------------------------------------------
def gat_reference(params, x, adj_i8, *, heads, hidden, out_channels):
    n = x.shape[0]
    adj = adj_i8.astype(jnp.float32)
    adj = adj.at[jnp.arange(n), jnp.arange(n)].set(1.0)  # add self-loops

    def bf16_round(w):  # match the kernel's bf16 projection weights
        return w.astype(jnp.bfloat16).astype(jnp.float32)

    def conv(h, w, att_src, att_dst, bias, concat):
        nh, fo = att_src.shape
        xw = (h @ bf16_round(w)).reshape(n, nh, fo)
        a_src = jnp.einsum("nhf,hf->nh", xw, att_src)
        a_dst = jnp.einsum("nhf,hf->nh", xw, att_dst)
        e = a_dst[:, None, :] + a_src[None, :, :]          # [tgt, src, head]
        e = jnp.where(e >= 0, e, 0.2 * e)
        e = jnp.where(adj[:, :, None] > 0, e, -jnp.inf)
        p = jax.nn.softmax(e, axis=1)
        out = jnp.einsum("tsh,shf->thf", p, xw)
        out = out.reshape(n, nh * fo) if concat else jnp.mean(out, axis=1)
        return out + bias

    h1 = jax.nn.relu(conv(x, params["w1"], params["att_src1"],
                          params["att_dst1"], params["b1"], True))
    h2 = conv(h1, params["w2"], params["att_src2"], params["att_dst2"],
              params["b2"], False)
    return jax.nn.log_softmax(h2, axis=1)


# ----------------------------------------------------------------------------
if __name__ == "__main__":
    N = 200                     # nodes
    in_channels, hidden, out_channels, heads = 8, 8, 4, 8

    key = jax.random.PRNGKey(0)
    kx, kp, ke = jax.random.split(key, 3)
    x = jax.random.normal(kx, (N, in_channels), jnp.float32)

    # Deterministic sparse graph: bidirectional ring + a few extra edges.
    ring_src = jnp.arange(N)
    ring_dst = (jnp.arange(N) + 1) % N
    extra_src = jax.random.randint(ke, (4 * N,), 0, N)
    extra_dst = (extra_src * 7 + 13) % N
    src = jnp.concatenate([ring_src, ring_dst, extra_src])
    dst = jnp.concatenate([ring_dst, ring_src, extra_dst])
    adj = jnp.zeros((N, N), jnp.int8).at[dst, src].set(1)  # adj[target, source]

    params = init_gat_params(kp, in_channels, hidden, out_channels, heads)

    # max_chunk=128 exercises the multi-row-tile AND multi-chunk (online
    # softmax) paths even at this small node count.
    out = gat_forward(params, x, adj, heads=heads, hidden=hidden,
                      out_channels=out_channels, max_chunk=128)
    out = jax.block_until_ready(out)

    assert out.shape == (N, out_channels)
    assert bool(jnp.all(jnp.isfinite(out)))
    # log_softmax rows must sum (in prob space) to ~1
    assert bool(jnp.allclose(jnp.sum(jnp.exp(out), axis=1), 1.0, atol=1e-3))
    # Compare against a pure-JAX reference; slack covers bf16 MXU/elementwise
    # activations and the approx reciprocal (structural bugs are >> this).
    ref = gat_reference(params, x, adj, heads=heads, hidden=hidden,
                        out_channels=out_channels)
    err = jnp.abs(out - ref)
    assert float(jnp.max(err)) < 0.3 and float(jnp.mean(err)) < 0.08
    print("KERNEL_OK")
</pallas_src>

<mosaic_0001>
module attributes {stable_mosaic.version = 11 : i64} {
  func.func @_gat_proj_kernel(%arg0: i32, %arg1: memref<64x8xf32, #tpu.memory_space<vmem>>, %arg2: memref<8x128xbf16, #tpu.memory_space<vmem>>, %arg3: memref<128x16xf32, #tpu.memory_space<vmem>>, %arg4: memref<64x128xbf16, #tpu.memory_space<vmem>>, %arg5: memref<64x16xf32, #tpu.memory_space<vmem>>) attributes {dimension_semantics = [#tpu.dimension_semantics<parallel>], iteration_bounds = array<i64: 4>, scalar_prefetch = 0 : i64, scratch_operands = 0 : i64, tpu.core_type = #tpu.core_type<tc>, window_params = [{transform_indices = @transform_0, window_bounds = array<i64: 64, 8>}, {pipeline_mode = #tpu.pipeline_mode<synchronous>, transform_indices = @transform_1, window_bounds = array<i64: 8, 128>}, {pipeline_mode = #tpu.pipeline_mode<synchronous>, transform_indices = @transform_2, window_bounds = array<i64: 128, 16>}, {transform_indices = @transform_3, window_bounds = array<i64: 64, 128>}, {transform_indices = @transform_4, window_bounds = array<i64: 64, 16>}]} {
    %c0 = arith.constant 0 : index
    %c0_0 = arith.constant 0 : index
    %0 = vector.load %arg1[%c0, %c0_0] : memref<64x8xf32, #tpu.memory_space<vmem>>, vector<64x8xf32>
    %1 = arith.truncf %0 : vector<64x8xf32> to vector<64x8xbf16>
    %c0_1 = arith.constant 0 : index
    %c0_2 = arith.constant 0 : index
    %2 = vector.load %arg2[%c0_1, %c0_2] : memref<8x128xbf16, #tpu.memory_space<vmem>>, vector<8x128xbf16>
    %cst = arith.constant dense<0.000000e+00> : vector<64x128xf32>
    %3 = tpu.matmul %1, %2, %cst {dimension_numbers = #tpu.dot_dimension_numbers<[1], [0], [0], [1], [0, 0, 1, 1], [], []>} : vector<64x8xbf16>, vector<8x128xbf16>, vector<64x128xf32> -> vector<64x128xf32>
    %c0_3 = arith.constant 0 : index
    %c0_4 = arith.constant 0 : index
    %4 = vector.load %arg3[%c0_3, %c0_4] : memref<128x16xf32, #tpu.memory_space<vmem>>, vector<128x16xf32>
    %cst_5 = arith.constant dense<0.000000e+00> : vector<64x16xf32>
    %5 = tpu.matmul %3, %4, %cst_5 {dimension_numbers = #tpu.dot_dimension_numbers<[1], [0], [0], [1], [0, 0, 1, 1], [], []>} : vector<64x128xf32>, vector<128x16xf32>, vector<64x16xf32> -> vector<64x16xf32>
    %c0_6 = arith.constant 0 : index
    %c0_7 = arith.constant 0 : index
    %6 = vector.load %arg5[%c0_6, %c0_7] : memref<64x16xf32, #tpu.memory_space<vmem>>, vector<64x16xf32>
    tpu.vector_store %arg5[%c0_6, %c0_7], %5 {strides = array<i32>} : memref<64x16xf32, #tpu.memory_space<vmem>>, vector<64x16xf32>,
    %7 = arith.truncf %3 : vector<64x128xf32> to vector<64x128xbf16>
    %c0_8 = arith.constant 0 : index
    %c0_9 = arith.constant 0 : index
    %8 = vector.load %arg4[%c0_8, %c0_9] : memref<64x128xbf16, #tpu.memory_space<vmem>>, vector<64x128xbf16>
    tpu.vector_store %arg4[%c0_8, %c0_9], %7 {strides = array<i32>} : memref<64x128xbf16, #tpu.memory_space<vmem>>, vector<64x128xbf16>,
    return
  }
  func.func @transform_0(%arg0: i32) -> (i32, i32) {
    %c0_i32 = arith.constant 0 : i32
    %c0_i32_0 = arith.constant 0 : i32
    return %arg0, %c0_i32 : i32, i32
  }
  func.func @transform_1(%arg0: i32) -> (i32, i32) {
    %c0_i32 = arith.constant 0 : i32
    %c0_i32_0 = arith.constant 0 : i32
    %c0_i32_1 = arith.constant 0 : i32
    return %c0_i32, %c0_i32_0 : i32, i32
  }
  func.func @transform_2(%arg0: i32) -> (i32, i32) {
    %c0_i32 = arith.constant 0 : i32
    %c0_i32_0 = arith.constant 0 : i32
    %c0_i32_1 = arith.constant 0 : i32
    return %c0_i32, %c0_i32_0 : i32, i32
  }
  func.func @transform_3(%arg0: i32) -> (i32, i32) {
    %c0_i32 = arith.constant 0 : i32
    %c0_i32_0 = arith.constant 0 : i32
    return %arg0, %c0_i32 : i32, i32
  }
  func.func @transform_4(%arg0: i32) -> (i32, i32) {
    %c0_i32 = arith.constant 0 : i32
    %c0_i32_0 = arith.constant 0 : i32
    return %arg0, %c0_i32 : i32, i32
  }
}

</mosaic_0001>

<bundles_post_ra>
// kernel: tpu_custom_call.1
= control target key start
LH: loop header
LB: loop body
LE: loop exit
PB: predicated region body
PF: predicated region fallthrough
CT: control target
= control target key end

     0   :  { %10 = vsyncpa [#allocation3], 0  ;;  %s1091_s0 = inlined_call_operand.vmem [shape: f32[256,8], index: 0, kind: input, shape index: {}]   ;;  %s1092_s1 = inlined_call_operand.vmem [shape: bf16[8,128], index: 1, kind: input, shape index: {}]   ;;  %s1093_s2 = inlined_call_operand.vmem [shape: f32[128,16], index: 2, kind: input, shape index: {}]   ;;  %s1094_s3 = inlined_call_operand.hbm [shape: bf16[256,128], index: 3, kind: output, shape index: {0}]   ;;  %s1095_s4 = inlined_call_operand.vmem [shape: f32[256,16], index: 4, kind: output, shape index: {1}]  }
   0x1   :  { %12 = vsyncpa [#allocation3 + $0x1], 0  ;;  %s912_s15 = smov 0   ;;  %s914_s16 = smov 0  }
   0x2   :  { %s916_s17 = smov 0   ;;  %s918_s18 = smov 0  }
   0x3 LB: > { %s933_s19 = sadd.s32 4294967295, %s882_s18   ;;  %s589_s20 = sadd.s32 4294967294, %s882_s18   ;;  %s882_s18 = sphi %s918_s18, %s1101_s18   ;;  %s878_s17 = sphi %s916_s17, %s1100_s17   ;;  %s874_s16 = sphi %s914_s16, %s1099_s16   ;;  %s870_s15 = sphi %s912_s15, %s1098_s15  }
   0x4   : > { %s937_s21 = sadd.s32 1, %s882_s18   ;;  %s93_s22 = sadd.s32 1, %s878_s17 }
   0x5   : > { %s90_s23 = ssub.s32 %s882_s18, %s937_s21  ;;  %p103_p0 = scmp.ne.s32.totalorder %s878_s17, %s874_s16 }
   0x6   : > { %p91_p1 = scmp.eq.s32.totalorder %s90_s23, 0  ;;  %p104_p2 = scmp.eq.s32.totalorder %s933_s19, 3 }
   0x7   : > { %p109_p3 = scmp.ne.s32.totalorder %s874_s16, %s870_s15  ;;  %p110_p4 = scmp.eq.s32.totalorder %s589_s20, 3 }
   0x8   : > { %s948_s24 = scalar_select %p91_p1, %s878_s17, %s93_s22  }
   0x9   : > { %p950_p5 = por %p104_p2, %p103_p0  ;;  %p954_p6 = por %p110_p4, %p109_p3 }
   0xa   : > { %p592_p7 = scmp.ge.s32.totalorder %s882_s18, 1  ;;  %p169_p8 = scmp.lt.s32.totalorder %s882_s18, 5 }
   0xc   : > { %p170_p9 = pnand %p592_p7, %p169_p8 }
   0xd   : > { %v226_v0 = vld [vmem:[%s1092_s1] sm:$0xf] (!%p170_p9)  ;;  %vm240_vm0 = vcmask (!%p170_p9), 1043456   ;;  %s594_s29 = sshll.u32 (!%p170_p9), %s933_s19, 3  ;;  %v310_v3 = vld [vmem:[%s1093_s2 + $0x8] sm:$0xff] (!%p170_p9)  ;;  %v311_v4 = vld [vmem:[%s1093_s2 + $0x10] sm:$0xff] (!%p170_p9) }
   0xe   : > { %173 = sbr.rel (%p170_p9) target bundleno = 469 (0x1d5), region = 32  ;;  %v309_v1 = vld [vmem:[%s1093_s2] sm:$0xff] (!%p170_p9)  ;;  %778 = vmatprep.subr.msk.bf16.mxu0 (!%p170_p9), %vm240_vm0, %v226_v0  ;;  %v242_v2 = vsel (!%p170_p9), %vm240_vm0, %v226_v0, 0  ;;  %p201_p10 = scmp.lt.s32.totalorder (!%p170_p9), %s594_s29, 31  ;;  %v312_v5 = vld [vmem:[%s1093_s2 + $0x18] sm:$0xff] (!%p170_p9)  ;;  %v314_v9 = vld [vmem:[%s1093_s2 + $0x28] sm:$0xff] (!%p170_p9) }
   0xf   : > { %677 = vmatpush3.bf16.msra.mxu0 (!%p170_p9), %v242_v2  ;;  %v730_v6 = vpack.c.bf16 (!%p170_p9), %v310_v3, %v309_v1  ;;  %v734_v7 = vpack.c.bf16 (!%p170_p9), %v312_v5, %v311_v4  ;;  %v313_v8 = vld [vmem:[%s1093_s2 + $0x20] sm:$0xff] (!%p170_p9)  ;;  %v315_v11 = vld [vmem:[%s1093_s2 + $0x30] sm:$0xff] (!%p170_p9)  ;;  %v316_v12 = vld [vmem:[%s1093_s2 + $0x38] sm:$0xff] (!%p170_p9)  ;;  %vm227_vm1 = vcmask (!%p170_p9), 64512   ;;  %s190_s9 = sand.u32 (!%p170_p9), 1, %s874_s16   ;;  %s623_s13 = sshll.u32 (!%p170_p9), %s933_s19, 9 }
  0x10   : > { %v738_v10 = vpack.c.bf16 (!%p170_p9), %v314_v9, %v313_v8  ;;  %v742_v22 = vpack.c.bf16 (!%p170_p9), %v316_v12, %v315_v11  ;;  %v317_v23 = vld [vmem:[%s1093_s2 + $0x40] sm:$0xff] (!%p170_p9)  ;;  %v318_v24 = vld [vmem:[%s1093_s2 + $0x48] sm:$0xff] (!%p170_p9)  ;;  %v319_v29 = vld [vmem:[%s1093_s2 + $0x50] sm:$0xff] (!%p170_p9)  ;;  %s593_s10 = sshll.u32 (!%p170_p9), %s190_s9, 5  ;;  %s1033_s23 = scalar_lea.hbm (!%p170_p9), %s1094_s3, %s623_s13 }
  0x11   : > { %762 = vmatprep.subr.bf16.mxu1 (!%p170_p9), %v730_v6  ;;  %731 = vmatprep.subr.bf16.mxu0 (!%p170_p9), %v730_v6  ;;  %v746_v27 = vpack.c.bf16 (!%p170_p9), %v318_v24, %v317_v23  ;;  %v320_v30 = vld [vmem:[%s1093_s2 + $0x58] sm:$0xff] (!%p170_p9)  ;;  %v321_v32 = vld [vmem:[%s1093_s2 + $0x60] sm:$0xff] (!%p170_p9)  ;;  %v322_v33 = vld [vmem:[%s1093_s2 + $0x68] sm:$0xff] (!%p170_p9)  ;;  %s192_s11 = scalar_lea.vmem (!%p170_p9), [#allocation2], %s593_s10  ;;  %s1037_s27 = scalar_lea.sflag (!%p170_p9), [#allocation3], %s190_s9 }
  0x12   : > { %770 = vmatpush3.bf16.msra.mxu1 (!%p170_p9), %v730_v6  ;;  %v750_v31 = vpack.c.bf16 (!%p170_p9), %v320_v30, %v319_v29  ;;  %v754_v34 = vpack.c.bf16 (!%p170_p9), %v322_v33, %v321_v32  ;;  %v323_v35 = vld [vmem:[%s1093_s2 + $0x70] sm:$0xff] (!%p170_p9)  ;;  %v324_v36 = vld [vmem:[%s1093_s2 + $0x78] sm:$0xff] (!%p170_p9)  ;;  %s498_s12 = sshll.u32 (!%p170_p9), %s192_s11, 4  ;;  %s884_s30 = smov (!%p170_p9), [#allocation2]   ;;  %s1027_s12 = int_to_ptr.vmem [resolvable:$true] %s498_s12 }
  0x13   : > { %763 = vmatprep.subr.bf16.mxu1 (!%p170_p9), %v734_v7  ;;  %v758_v37 = vpack.c.bf16 (!%p170_p9), %v324_v36, %v323_v35  ;;  %s824_s5 = sshll.u32 (!%p170_p9), %s884_s30, 4  ;;  %s825_s5 = int_to_ptr.vmem [resolvable:$false] %s824_s5 }
  0x14   : > { %s826_s6 = scalar_lea.vmem (!%p170_p9), %s825_s5, 1024  ;;  %p827_p0 = scmp.lt.s32.totalorder (!%p170_p9), %s1027_s12, %s825_s5 }
  0x15   : > { %s1103_s29 = smov (!%p201_p10, %s594_s29), 31 }
  0x16   : > { %s595_s22 = sshll.u32 %s1103_s29, 3  ;;  %771 = vmatpush3.bf16.msra.mxu1 %v734_v7 }
  0x17   : > { %s204_s28 = scalar_lea.vmem %s1091_s0, %s595_s22  ;;  %764 = vmatprep.subr.bf16.mxu1 %v738_v10 }
  0x18   : > { %v214_v13 = vld [vmem:[%s204_s28] sm:$0xff]  ;;  %v215_v14 = vld [vmem:[%s204_s28 + $0x8] sm:$0xff]  ;;  %v216_v15 = vld [vmem:[%s204_s28 + $0x10] sm:$0xff] }
  0x19   : > { %v222_v16 = vpack.c.bf16 %v215_v14, %v214_v13  ;;  %v217_v17 = vld [vmem:[%s204_s28 + $0x18] sm:$0xff]  ;;  %v218_v18 = vld [vmem:[%s204_s28 + $0x20] sm:$0xff]  ;;  %v219_v19 = vld [vmem:[%s204_s28 + $0x28] sm:$0xff] }
  0x1a   : > { %v223_v20 = vpack.c.bf16 %v217_v17, %v216_v15  ;;  %v224_v21 = vpack.c.bf16 %v219_v19, %v218_v18  ;;  %v220_v25 = vld [vmem:[%s204_s28 + $0x30] sm:$0xff]  ;;  %v221_v26 = vld [vmem:[%s204_s28 + $0x38] sm:$0xff]  ;;  %772 = vmatpush3.bf16.msra.mxu1 %v738_v10  ;;  %s820_s28 = scalar_lea.vmem %s1027_s12, 512 }
  0x1b   : > { %678 = vmatprep.mubr.msk.bf16.mxu0 %vm227_vm1, %v222_v16  ;;  %765 = vmatprep.subr.bf16.mxu1 %v742_v22  ;;  %v225_v28 = vpack.c.bf16 %v221_v26, %v220_v25  ;;  %p821_p11 = scmp.ne.s32.totalorder %s1027_s12, %s820_s28  ;;  %p828_p1 = scmp.lt.s32.totalorder %s826_s6, %s820_s28 }
  0x1c   : > { %679 = vmatmul.mubr.msk.bf16.vlgmr.msra.gmra.mrb[0].mxu0 %vm227_vm1, %v223_v20 }
  0x1d   : > { %682 = vmatprep.mubr.msk.bf16.mxu0 %vm227_vm1, %v224_v21  ;;  %733 = vmatpush3.bf16.msra.mxu0 %v730_v6  ;;  %p822_p12 = pnand %p821_p11, %p950_p5  ;;  %p829_p2 = por %p828_p1, %p827_p0 }
  0x1e   : > { %735 = vmatprep.subr.bf16.mxu0 %v734_v7  ;;  %773 = vmatpush3.bf16.msra.mxu1 %v742_v22 }
  0x1f   : > { %766 = vmatprep.subr.bf16.mxu1 %v746_v27  ;;  %p823_p13 = pneg %p822_p12 }
  0x21   : > { %737 = vmatpush3.bf16.msra.mxu0 %v734_v7  ;;  %p830_p3 = pnand %p829_p2, %p823_p13 }
  0x22   : > { %739 = vmatprep.subr.bf16.mxu0 %v738_v10  ;;  %774 = vmatpush3.bf16.msra.mxu1 %v746_v27 }
  0x23   : > { %767 = vmatprep.subr.bf16.mxu1 %v750_v31 }
  0x24   : > { %683 = vmatmul.mubr.msk.bf16.gmra.mrb[4].mxu0 %vm227_vm1, %v225_v28 }
  0x25   : > { %741 = vmatpush3.bf16.msra.mxu0 %v738_v10 }
  0x26   : > { %743 = vmatprep.subr.bf16.mxu0 %v742_v22  ;;  %775 = vmatpush3.bf16.msra.mxu1 %v750_v31 }
  0x27   : > { %768 = vmatprep.subr.bf16.mxu1 %v754_v34 }
  0x29   : > { %745 = vmatpush3.bf16.msra.mxu0 %v742_v22 }
  0x2a   : > { %747 = vmatprep.subr.bf16.mxu0 %v746_v27  ;;  %776 = vmatpush3.bf16.msra.mxu1 %v754_v34 }
  0x2b   : > { %769 = vmatprep.subr.bf16.mxu1 %v758_v37 }
  0x2d   : > { %749 = vmatpush3.bf16.msra.mxu0 %v746_v27 }
  0x2e   : > { %751 = vmatprep.subr.bf16.mxu0 %v750_v31  ;;  %777 = vmatpush3.bf16.msra.mxu1 %v758_v37 }
  0x31   : > { %753 = vmatpush3.bf16.msra.mxu0 %v750_v31 }
  0x32   : > { %755 = vmatprep.subr.bf16.mxu0 %v754_v34 }
  0x35   : > { %757 = vmatpush3.bf16.msra.mxu0 %v754_v34 }
  0x36   : > { %759 = vmatprep.subr.bf16.mxu0 %v758_v37 }
  0x39   : > { %761 = vmatpush3.bf16.msra.mxu0 %v758_v37 }
  0xef   : > { %v680_v38 = vpop.f32.mrb[0].mxu0 }
  0xf0   : > { %v278_v39 = vpop.f32.mrb[1].mxu0  ;;  %721 = vmatprep.mubr.f32.mxu1 %v680_v38 }
  0xf1   : > { %v681_v40 = vpop.f32.mrb[2].mxu0  ;;  %718 = vmatprep.mubr.f32.mxu0 %v278_v39 }
  0xf2   : > { %v632_v41 = vpack.c.bf16 %v681_v40, %v680_v38  ;;  %v281_v42 = vpop.f32.mrb[3].mxu0  ;;  %722 = vmatmul.mubr.f32.vlgmr.msra.gmra.mrb[0].mxu1 %v681_v40 }
  0xf3   : > { %v627_v43 = vpack.c.bf16 %v281_v42, %v278_v39  ;;  %719 = vmatmul.mubr.f32.vlgmr.msra.gmra.mrb[8].mxu0 %v281_v42 }
  0xf4   : > { %644 = vst [vmem:[%s192_s11 + $0x8] sm:$0xff] %v632_v41  }
  0xf5   : > { %628 = vst [vmem:[%s192_s11] sm:$0xff] %v627_v43  }
  0xf7   : > { %v684_v44 = vpop.f32.mrb[4].mxu0 }
  0xf8   : > { %v294_v45 = vpop.f32.mrb[5].mxu0 }
  0xf9   : > { %v685_v46 = vpop.f32.mrb[6].mxu0  ;;  %724 = vmatprep.mubr.f32.mxu1 %v294_v45 }
  0xfa   : > { %v642_v47 = vpack.c.bf16 %v685_v46, %v684_v44  ;;  %v297_v48 = vpop.f32.mrb[7].mxu0 }
  0xfb   : > { %v637_v49 = vpack.c.bf16 %v297_v48, %v294_v45  ;;  %725 = vmatmul.mubr.f32.gmra.mrb[2].mxu1 %v297_v48 }
  0xfc   : > { %646 = vst [vmem:[%s192_s11 + $0x18] sm:$0xff] %v642_v47   ;;  %727 = vmatprep.mubr.f32.mxu1 %v684_v44 }
  0xfd   : > { %645 = vst [vmem:[%s192_s11 + $0x10] sm:$0xff] %v637_v49  }
  0xff   : > { %728 = vmatmul.mubr.f32.gmra.mrb[4].mxu1 %v685_v46 }
 0x100   : > { %833 = shalt.err (!%p830_p3)
}
 0x101   : > { %s834_s19 = scalar_lea.hbm %s1033_s23, 512  ;;  %s838_s9 = scalar_lea.hbm %s1094_s3, 2048 }
 0x102   : > { %p835_p4 = scmp.ne.s32.totalorder %s1033_s23, %s834_s19  ;;  %p839_p9 = scmp.lt.u32.totalorder %s1033_s23, %s1094_s3 }
 0x103   : > { %p840_p10 = scmp.lt.u32.totalorder %s838_s9, %s834_s19  ;;  %p842_p12 = scmp.lt.u32.totalorder %s834_s19, %s1033_s23 }
 0x104   : > { %p836_p7 = pnand %p835_p4, %p950_p5 }
 0x105   : > { %p841_p11 = por %p840_p10, %p839_p9 }
 0x106   : > { %p837_p8 = pneg %p836_p7 }
 0x107   : > { %p843_p13 = por %p842_p12, %p841_p11 }
 0x109   : > { %p844_p0 = pnand %p843_p13, %p837_p8 }
 0x10b   : > { %847 = shalt.err (!%p844_p0)
}
 0x10c   : > { %s885_s13 = smov 64   ;;  %s886_s14 = smov 4   ;;  %vm430_vm2 = vcmask 130048  }
 0x10d   : > { %779 = dma.vmem_to_hbm [thread:$0]  (%p950_p5), %s1027_s12, 512, %s1033_s23, %s1037_s27, %s885_s13, %s885_s13, %s886_s14  }
 0x10e   : > { %s211_s30 = scalar_lea.vmem %s1095_s4, %s595_s22 }
 0x1c5   : > { %v723_v50 = vpop.f32.mrb[0].mxu1 }
 0x1c6   : > { %434 = vst.msk [vmem:[%s211_s30 + $0x18] sm:$0xff] %vm430_vm2, %v723_v50  ;;  %v720_v51 = vpop.f32.mrb[8].mxu0  ;;  %v401_v52 = vpop.f32.mrb[1].mxu1 }
 0x1c7   : > { %432 = vst.msk [vmem:[%s211_s30 + $0x8] sm:$0xff] %vm430_vm2, %v720_v51  ;;  %433 = vst.msk [vmem:[%s211_s30 + $0x10] sm:$0xff] %vm430_vm2, %v401_v52  ;;  %v391_v53 = vpop.f32.mrb[9].mxu0 }
 0x1c8   : > { %431 = vst.msk [vmem:[%s211_s30] sm:$0xff] %vm430_vm2, %v391_v53 }
 0x1ce   : > { %v726_v54 = vpop.f32.mrb[2].mxu1 }
 0x1cf   : > { %436 = vst.msk [vmem:[%s211_s30 + $0x28] sm:$0xff] %vm430_vm2, %v726_v54  ;;  %v411_v55 = vpop.f32.mrb[3].mxu1 }
 0x1d0   : > { %435 = vst.msk [vmem:[%s211_s30 + $0x20] sm:$0xff] %vm430_vm2, %v411_v55 }
 0x1d2   : > { %v729_v56 = vpop.f32.mrb[4].mxu1 }
 0x1d3   : > { %438 = vst.msk [vmem:[%s211_s30 + $0x38] sm:$0xff] %vm430_vm2, %v729_v56  ;;  %v421_v57 = vpop.f32.mrb[5].mxu1 }
 0x1d4   : > { %437 = vst.msk [vmem:[%s211_s30 + $0x30] sm:$0xff] %vm430_vm2, %v421_v57 }
 0x1d5 PF: > { %p785_p5 = scmp.ge.s32.totalorder %s882_s18, 2  ;;  %s517_s25 = sand.u32 1, %s870_s15  }
 0x1d6   : > { %s518_s29 = scalar_lea.sflag [#allocation3], %s517_s25 }
 0x1d7   : > { %p782_p1 = pnand %p785_p5, %p954_p6 }
 0x1d9   : > { %865 = dma.done.wait (!%p782_p1), %s518_s29, 512  }
 0x1da   : > { %867 = vsyncadd (!%p782_p1), %s518_s29, 4294966784  ;;  %p15_p2 = scmp.ge.s32.totalorder %s937_s21, 6   ;;  %s1098_s15 = smov %s874_s16 }
 0x1db   : > { %s1099_s16 = smov %s878_s17  ;;  %s1100_s17 = smov %s948_s24 }
 0x1dc   : > { %s1101_s18 = smov %s937_s21  ;;  %17 = sbr.rel (!%p15_p2) target bundleno = 3 (0x3), region = 79 }
 0x1e3   :  { %531 = vsyncpa [#allocation3], 1 }
 0x1e4   :  { %533 = vsyncpa [#allocation3 + $0x1], 1 }

</bundles_post_ra>
